<compile_context>
chip_gen: v7x
topology: tpu7x:2x2x1
jax: 0.10.0
libtpu: 0.0.40
codegen_flags: <defaults>
</compile_context>

<pallas_src>
import jax
import jax.numpy as jnp
from jax.experimental import pallas as pl
from jax.experimental.pallas import tpu as pltpu


def _residual_ff_kernel(x_ref, w1_ref, w2_ref, o_ref, acc_ref):
    # x_ref: (tm, D) original dtype, w1_ref: (D, th), w2_ref: (th, D) compute
    # dtype, o_ref: (tm, D), acc_ref: (tm, D) f32 scratch.
    h_idx = pl.program_id(1)
    x = x_ref[...]

    @pl.when(h_idx == 0)
    def _init():
        # Seed the accumulator with the residual (full-precision x), so the
        # finalize is just a cast and no extra zero-fill/add pass is needed.
        acc_ref[...] = x.astype(jnp.float32)

    # MXU runs in the (possibly bf16) weight dtype; accumulation stays f32.
    xc = x.astype(w1_ref.dtype)
    h = jnp.dot(xc, w1_ref[...], preferred_element_type=jnp.float32)
    # GELU is elementwise along H, so it commutes with the H-tiling.
    # TODO(synk): PyTorch nn.GELU default is exact erf; tanh approx differs ~1e-3.
    h = jax.nn.gelu(h, approximate=True)
    acc_ref[...] += jnp.dot(h.astype(w2_ref.dtype), w2_ref[...],
                            preferred_element_type=jnp.float32)

    @pl.when(h_idx == pl.num_programs(1) - 1)
    def _finalize():
        o_ref[...] = acc_ref[...].astype(o_ref.dtype)


def _round_up(v, m):
    return (v + m - 1) // m * m


def _pick_tile(total, target, align):
    """Largest multiple of `align` that divides `total` and is <= target."""
    if total <= target:
        return total
    best = align
    t = align
    while t <= target:
        if total % t == 0:
            best = t
        t += align
    return best


def residual_ff(x, w1, w2, *, tm=None, th=None, compute_dtype=None,
                alias_input=False, vmem_budget_bytes=None):
    """Computes fn(x) + x with fn(x) = gelu(x @ w1) @ w2, fused in one kernel.

    x : (M, D)  — M = batch * seq tokens (never copied/padded by the wrapper)
    w1: (D, H)
    w2: (H, D)

    tm: row tile (auto: 512 when weights VMEM-resident, else 1024, clamped to
        the VMEM budget).
    th: hidden tile for the reduction axis (auto: full H when the weights fit
        ~60% of the VMEM budget so they are streamed from HBM exactly once).
    compute_dtype: MXU dtype (auto: bf16 when weights are f32). The residual
        add always uses the original-precision x.
    alias_input: alias x with the output (mirrors PyTorch's in-place add_
        branch). The caller must not reuse x afterwards.
    """
    M, D = x.shape
    D2, H = w1.shape
    H2, D3 = w2.shape
    assert D == D2 and H == H2 and D == D3, "weight shapes must match x's dim"

    out_dtype = x.dtype

    if compute_dtype is None:
        compute_dtype = jnp.bfloat16 if w1.dtype == jnp.float32 else w1.dtype
    w1 = w1.astype(compute_dtype)
    w2 = w2.astype(compute_dtype)

    # Per-chip VMEM budget (v7x has only 64 MiB per TensorCore).
    if vmem_budget_bytes is None:
        cap = None
        try:
            cap = getattr(pltpu.get_tpu_info(), "vmem_capacity_bytes", None)
        except Exception:
            cap = None
        if not cap:
            cap = 64 << 20
        vmem_budget_bytes = int(cap * 0.85)

    isz_x = jnp.dtype(x.dtype).itemsize
    isz_w = jnp.dtype(compute_dtype).itemsize
    isz_o = jnp.dtype(out_dtype).itemsize

    def weight_tile_bytes(th_):
        # double-buffered w1 + w2 tiles
        return 2 * 2 * D * th_ * isz_w

    # ---- hidden (reduction) tile -------------------------------------------
    if th is None and weight_tile_bytes(H) <= int(0.6 * vmem_budget_bytes):
        th = H  # weights fully VMEM-resident -> DMA'd from HBM exactly once
    if th is None or th >= H:
        th_eff, Hp = H, H            # full dim: no H padding, constant block idx
    else:
        align = 256 if (H % 256 == 0 and th >= 256) else 128
        Hp = _round_up(H, align)
        th_eff = _pick_tile(Hp, max(th, align), align)
    weights_resident = (th_eff == Hp)

    # Zero-pad only the (small) weights along H when tiling requires it; the
    # zero columns/rows contribute exactly 0 (gelu(0) = 0) to the output.
    if Hp != H:
        w1 = jnp.pad(w1, ((0, 0), (0, Hp - H)))
        w2 = jnp.pad(w2, ((0, Hp - H), (0, 0)))

    # ---- row tile ------------------------------------------------------------
    w_bytes = weight_tile_bytes(th_eff)
    per_row_bytes = D * (2 * isz_x + 2 * isz_o + 4)   # 2x x, 2x out, f32 acc
    tm_budget = max(8, (vmem_budget_bytes - w_bytes) // per_row_bytes)
    if tm is None:
        tm = 512 if weights_resident else 1024
    tm_eff = int(min(tm, tm_budget))
    tm_eff = max(8, (tm_eff // 8) * 8)
    if tm_eff >= M:
        tm_eff = M                   # single full-dim row block (always legal)

    grid = (pl.cdiv(M, tm_eff), Hp // th_eff)

    # VMEM footprint (+ f32 matmul/gelu temporaries) with ~25% headroom,
    # clamped to the hardware budget.
    est = (w_bytes
           + tm_eff * per_row_bytes
           + 2 * tm_eff * th_eff * 4)
    vmem_limit = int(min(max(int(est * 1.25), 16 << 20), vmem_budget_bytes))

    io_aliases = {0: 0} if (alias_input and x.dtype == out_dtype) else {}

    return pl.pallas_call(
        _residual_ff_kernel,
        out_shape=jax.ShapeDtypeStruct((M, D), out_dtype),
        grid_spec=pltpu.PrefetchScalarGridSpec(
            num_scalar_prefetch=0,
            grid=grid,
            in_specs=[
                pl.BlockSpec((tm_eff, D), lambda i, h: (i, 0)),   # x row tile
                pl.BlockSpec((D, th_eff), lambda i, h: (0, h)),   # w1 H-tile
                pl.BlockSpec((th_eff, D), lambda i, h: (h, 0)),   # w2 H-tile
            ],
            out_specs=pl.BlockSpec((tm_eff, D), lambda i, h: (i, 0)),
            scratch_shapes=[pltpu.VMEM((tm_eff, D), jnp.float32)],
        ),
        compiler_params=pltpu.CompilerParams(
            dimension_semantics=("parallel", "arbitrary"),
            vmem_limit_bytes=vmem_limit),
        input_output_aliases=io_aliases,
    )(x, w1, w2)


def residual_ff_ref(x, w1, w2):
    y = jax.nn.gelu(x @ w1, approximate=True) @ w2
    return y + x


if __name__ == "__main__":
    key = jax.random.PRNGKey(0)
    kx, k1, k2, k3, k4, k5 = jax.random.split(key, 6)

    # --- Test 1: module-scale shapes (batch=2, seq=8, dim=32, hidden=64) ----
    batch, seq, dim, hidden = 2, 8, 32, 64
    x = jax.random.normal(kx, (batch, seq, dim), dtype=jnp.float32)
    w1 = jax.random.normal(k1, (dim, hidden), dtype=jnp.float32) * (dim ** -0.5)
    w2 = jax.random.normal(k2, (hidden, dim), dtype=jnp.float32) * (hidden ** -0.5)

    x2d = x.reshape(batch * seq, dim)              # glue reshape in plain JAX
    ref = residual_ff_ref(x2d, w1, w2).reshape(batch, seq, dim)

    # default bf16 MXU path (f32 residual / accumulation)
    out = jax.block_until_ready(residual_ff(x2d, w1, w2)).reshape(batch, seq, dim)
    assert out.shape == (batch, seq, dim)
    assert jnp.allclose(out, ref, atol=3e-2, rtol=3e-2), "mismatch (bf16 path)"

    # full f32 compute path, tight tolerance
    out_f32 = jax.block_until_ready(
        residual_ff(x2d, w1, w2, compute_dtype=jnp.float32)).reshape(batch, seq, dim)
    assert jnp.allclose(out_f32, ref, atol=1e-5, rtol=1e-5), "mismatch (f32 path)"

    # --- Test 2: forced H-tiling (reduction grid axis > 1) -------------------
    dim2, hidden2 = 32, 256
    xb = jax.random.normal(k3, (batch * seq, dim2), dtype=jnp.float32)
    w1b = jax.random.normal(k4, (dim2, hidden2), dtype=jnp.float32) * (dim2 ** -0.5)
    w2b = jax.random.normal(k5, (hidden2, dim2), dtype=jnp.float32) * (hidden2 ** -0.5)
    refb = residual_ff_ref(xb, w1b, w2b)

    out2 = jax.block_until_ready(residual_ff(xb, w1b, w2b, th=128))
    assert jnp.allclose(out2, refb, atol=3e-2, rtol=3e-2), "mismatch (H-tiled bf16)"
    out2f = jax.block_until_ready(
        residual_ff(xb, w1b, w2b, th=128, compute_dtype=jnp.float32))
    assert jnp.allclose(out2f, refb, atol=1e-3, rtol=1e-3), "mismatch (H-tiled f32)"

    # --- Test 3: partial row block + zero-padded hidden dim ------------------
    M3, dim3, hidden3 = 20, 32, 200
    xc = jax.random.normal(k1, (M3, dim3), dtype=jnp.float32)
    w1c = jax.random.normal(k2, (dim3, hidden3), dtype=jnp.float32) * (dim3 ** -0.5)
    w2c = jax.random.normal(k3, (hidden3, dim3), dtype=jnp.float32) * (hidden3 ** -0.5)
    refc = residual_ff_ref(xc, w1c, w2c)

    out3 = jax.block_until_ready(
        residual_ff(xc, w1c, w2c, th=128, tm=8, compute_dtype=jnp.float32))
    assert jnp.allclose(out3, refc, atol=1e-3, rtol=1e-3), "mismatch (padded/partial)"

    print("KERNEL_OK")
</pallas_src>

<mosaic_0001>
module attributes {stable_mosaic.version = 11 : i64} {
  func.func @_residual_ff_kernel(%arg0: i32, %arg1: i32, %arg2: memref<16x32xf32, #tpu.memory_space<vmem>>, %arg3: memref<32x64xbf16, #tpu.memory_space<vmem>>, %arg4: memref<64x32xbf16, #tpu.memory_space<vmem>>, %arg5: memref<16x32xf32, #tpu.memory_space<vmem>>, %arg6: memref<16x32xf32, #tpu.memory_space<vmem>>) attributes {dimension_semantics = [#tpu.dimension_semantics<parallel>, #tpu.dimension_semantics<arbitrary>], iteration_bounds = array<i64: 1, 1>, scalar_prefetch = 0 : i64, scratch_operands = 1 : i64, tpu.core_type = #tpu.core_type<tc>, window_params = [{transform_indices = @transform_0, window_bounds = array<i64: 16, 32>}, {transform_indices = @transform_1, window_bounds = array<i64: 32, 64>}, {transform_indices = @transform_2, window_bounds = array<i64: 64, 32>}, {transform_indices = @transform_3, window_bounds = array<i64: 16, 32>}]} {
    %c0 = arith.constant 0 : index
    %c0_0 = arith.constant 0 : index
    %0 = vector.load %arg2[%c0, %c0_0] : memref<16x32xf32, #tpu.memory_space<vmem>>, vector<16x32xf32>
    %c0_i32 = arith.constant 0 : i32
    %1 = arith.cmpi eq, %arg1, %c0_i32 : i32
    %2 = arith.extui %1 : i1 to i32
    %c0_i32_1 = arith.constant 0 : i32
    %3 = arith.cmpi ne, %2, %c0_i32_1 : i32
    scf.if %3 {
      %c0_17 = arith.constant 0 : index
      %c0_18 = arith.constant 0 : index
      %29 = vector.load %arg6[%c0_17, %c0_18] : memref<16x32xf32, #tpu.memory_space<vmem>>, vector<16x32xf32>
      tpu.vector_store %arg6[%c0_17, %c0_18], %0 {strides = array<i32>} : memref<16x32xf32, #tpu.memory_space<vmem>>, vector<16x32xf32>,
    } else {
    }
    %4 = arith.truncf %0 : vector<16x32xf32> to vector<16x32xbf16>
    %c0_2 = arith.constant 0 : index
    %c0_3 = arith.constant 0 : index
    %5 = vector.load %arg3[%c0_2, %c0_3] : memref<32x64xbf16, #tpu.memory_space<vmem>>, vector<32x64xbf16>
    %cst = arith.constant dense<0.000000e+00> : vector<16x64xf32>
    %6 = tpu.matmul %4, %5, %cst {dimension_numbers = #tpu.dot_dimension_numbers<[1], [0], [0], [1], [0, 0, 1, 1], [], []>} : vector<16x32xbf16>, vector<32x64xbf16>, vector<16x64xf32> -> vector<16x64xf32>
    %7 = arith.mulf %6, %6 : vector<16x64xf32>
    %8 = arith.mulf %6, %7 : vector<16x64xf32>
    %cst_4 = arith.constant 4.471500e-02 : f32
    %9 = vector.broadcast %cst_4 : f32 to vector<16x64xf32>
    %10 = arith.mulf %9, %8 : vector<16x64xf32>
    %11 = arith.addf %6, %10 : vector<16x64xf32>
    %cst_5 = arith.constant 0.797884583 : f32
    %12 = vector.broadcast %cst_5 : f32 to vector<16x64xf32>
    %13 = arith.mulf %12, %11 : vector<16x64xf32>
    %14 = math.tanh %13 : vector<16x64xf32>
    %cst_6 = arith.constant 1.000000e+00 : f32
    %15 = vector.broadcast %cst_6 : f32 to vector<16x64xf32>
    %16 = arith.addf %15, %14 : vector<16x64xf32>
    %cst_7 = arith.constant 5.000000e-01 : f32
    %17 = vector.broadcast %cst_7 : f32 to vector<16x64xf32>
    %18 = arith.mulf %17, %16 : vector<16x64xf32>
    %19 = arith.mulf %6, %18 : vector<16x64xf32>
    %c0_8 = arith.constant 0 : index
    %c0_9 = arith.constant 0 : index
    %20 = vector.load %arg6[%c0_8, %c0_9] : memref<16x32xf32, #tpu.memory_space<vmem>>, vector<16x32xf32>
    %21 = arith.truncf %19 : vector<16x64xf32> to vector<16x64xbf16>
    %c0_10 = arith.constant 0 : index
    %c0_11 = arith.constant 0 : index
    %22 = vector.load %arg4[%c0_10, %c0_11] : memref<64x32xbf16, #tpu.memory_space<vmem>>, vector<64x32xbf16>
    %cst_12 = arith.constant dense<0.000000e+00> : vector<16x32xf32>
    %23 = tpu.matmul %21, %22, %cst_12 {dimension_numbers = #tpu.dot_dimension_numbers<[1], [0], [0], [1], [0, 0, 1, 1], [], []>} : vector<16x64xbf16>, vector<64x32xbf16>, vector<16x32xf32> -> vector<16x32xf32>
    %24 = arith.addf %20, %23 : vector<16x32xf32>
    %c0_13 = arith.constant 0 : index
    %c0_14 = arith.constant 0 : index
    %25 = vector.load %arg6[%c0_13, %c0_14] : memref<16x32xf32, #tpu.memory_space<vmem>>, vector<16x32xf32>
    tpu.vector_store %arg6[%c0_13, %c0_14], %24 {strides = array<i32>} : memref<16x32xf32, #tpu.memory_space<vmem>>, vector<16x32xf32>,
    %c0_i32_15 = arith.constant 0 : i32
    %26 = arith.cmpi eq, %arg1, %c0_i32_15 : i32
    %27 = arith.extui %26 : i1 to i32
    %c0_i32_16 = arith.constant 0 : i32
    %28 = arith.cmpi ne, %27, %c0_i32_16 : i32
    scf.if %28 {
      %c0_17 = arith.constant 0 : index
      %c0_18 = arith.constant 0 : index
      %29 = vector.load %arg6[%c0_17, %c0_18] : memref<16x32xf32, #tpu.memory_space<vmem>>, vector<16x32xf32>
      %c0_19 = arith.constant 0 : index
      %c0_20 = arith.constant 0 : index
      %30 = vector.load %arg5[%c0_19, %c0_20] : memref<16x32xf32, #tpu.memory_space<vmem>>, vector<16x32xf32>
      tpu.vector_store %arg5[%c0_19, %c0_20], %29 {strides = array<i32>} : memref<16x32xf32, #tpu.memory_space<vmem>>, vector<16x32xf32>,
    } else {
    }
    return
  }
  func.func @transform_0(%arg0: i32, %arg1: i32) -> (i32, i32) {
    %c0_i32 = arith.constant 0 : i32
    %c0_i32_0 = arith.constant 0 : i32
    return %arg0, %c0_i32 : i32, i32
  }
  func.func @transform_1(%arg0: i32, %arg1: i32) -> (i32, i32) {
    %c0_i32 = arith.constant 0 : i32
    %c0_i32_0 = arith.constant 0 : i32
    return %c0_i32, %arg1 : i32, i32
  }
  func.func @transform_2(%arg0: i32, %arg1: i32) -> (i32, i32) {
    %c0_i32 = arith.constant 0 : i32
    %c0_i32_0 = arith.constant 0 : i32
    return %arg1, %c0_i32 : i32, i32
  }
  func.func @transform_3(%arg0: i32, %arg1: i32) -> (i32, i32) {
    %c0_i32 = arith.constant 0 : i32
    %c0_i32_0 = arith.constant 0 : i32
    return %arg0, %c0_i32 : i32, i32
  }
}

</mosaic_0001>

<bundles_post_ra>
// kernel: tpu_custom_call.1
= control target key start
LH: loop header
LB: loop body
LE: loop exit
PB: predicated region body
PF: predicated region fallthrough
CT: control target
= control target key end

     0   :  { %v287_v1 = vmov 0.0   ;;  %vm288_vm0 = vmmov 0   ;;  %vm22_vm1 = vcmask 261120   ;;  %s355_s0 = inlined_call_operand.vmem [shape: f32[16,32], index: 0, kind: input, shape index: {}]   ;;  %s356_s1 = inlined_call_operand.vmem [shape: bf16[32,64], index: 1, kind: input, shape index: {}]   ;;  %s357_s2 = inlined_call_operand.vmem [shape: bf16[64,32], index: 2, kind: input, shape index: {}]   ;;  %s358_s3 = inlined_call_operand.hbm [shape: f32[16,32], index: 3, kind: output, shape index: {}]  }
   0x1   :  { %v253_v0 = vld [vmem:[%s356_s1] sm:$0xff]   ;;  %228 = vmatprep.subr.bf16.mxu0 %v287_v1  ;;  %v254_v2 = vld [vmem:[%s356_s1 + $0x8] sm:$0xff]   ;;  %236 = vmatprep.subr.bf16.mxu1 %v287_v1 }
   0x2   :  { %229 = vmatpush3.bf16.msra.mxu0 %v253_v0  ;;  %232 = vmatprep.mubr.msk.bf16.mxu0 %vm288_vm0, %v287_v1  ;;  %v16_v3 = vld [vmem:[%s355_s0] sm:$0xff]  ;;  %v17_v4 = vld [vmem:[%s355_s0 + $0x8] sm:$0xff] }
   0x3   :  { %230 = vmatprep.subr.bf16.mxu0 %v287_v1  ;;  %23 = vst.msk [vmem:[#allocation2] sm:$0xff] %vm22_vm1, %v16_v3  ;;  %24 = vst.msk [vmem:[#allocation2 + $0x8] sm:$0xff] %vm22_vm1, %v17_v4  ;;  %244 = vmatprep.mubr.msk.bf16.mxu1 %vm288_vm0, %v287_v1  ;;  %v25_v5 = vpack.c.bf16 %v17_v4, %v16_v3 }
   0x4   :  { %8 = vsyncpa [#allocation4], 0  ;;  %v255_v6 = vld [vmem:[%s357_s2] sm:$0xff]   ;;  %v256_v7 = vld [vmem:[%s357_s2 + $0x8] sm:$0xff]   ;;  %vm140_vm2 = vcmask 523264  }
   0x5   :  { %237 = vmatpush3.bf16.msra.mxu1 %v255_v6  ;;  %v257_v8 = vld [vmem:[%s357_s2 + $0x10] sm:$0xff]   ;;  %v258_v9 = vld [vmem:[%s357_s2 + $0x18] sm:$0xff]   ;;  %s289_s2 = smov [#allocation3]  }
   0x6   :  { %231 = vmatpush3.bf16.msra.mxu0 %v254_v2  ;;  %238 = vmatprep.subr.bf16.mxu1 %v287_v1  ;;  %s201_s26 = sshll.u32 %s289_s2, 4  ;;  %s202_s26 = int_to_ptr.vmem [resolvable:$true] %s201_s26 }
   0x7   :  { %s263_s27 = scalar_lea.vmem %s202_s26, 256  ;;  %p268_p1 = scmp.lt.s32.totalorder %s202_s26, %s202_s26 }
   0x8   :  { %p264_p0 = scmp.ne.s32.totalorder %s202_s26, %s263_s27  ;;  %p269_p2 = scmp.lt.s32.totalorder %s263_s27, %s263_s27 }
   0x9   :  { %233 = vmatmul.mubr.msk.bf16.vlgmr.msra.gmra.mrb[0].mxu0 %vm22_vm1, %v25_v5  ;;  %239 = vmatpush3.bf16.msra.mxu1 %v256_v7 }
   0xa   :  { %240 = vmatprep.subr.bf16.mxu1 %v287_v1  ;;  %v105_v33 = vld [vmem:[#allocation2] sm:$0xff]  ;;  %v106_v35 = vld [vmem:[#allocation2 + $0x8] sm:$0xff]  ;;  %p270_p3 = por %p269_p2, %p268_p1 }
   0xc   :  { %p271_p4 = pnand %p270_p3, %p264_p0 }
   0xd   :  { %241 = vmatpush3.bf16.msra.mxu1 %v257_v8 }
   0xe   :  { %242 = vmatprep.subr.bf16.mxu1 %v287_v1 }
  0x11   :  { %243 = vmatpush3.bf16.msra.mxu1 %v258_v9 }
  0xdc   :  { %v80_v10 = vpop.f32.mrb[0].mxu0 }
  0xdd   :  { %v87_v11 = vmul.f32 %v80_v10, %v80_v10  ;;  %v234_v12 = vpop.f32.mrb[1].mxu0 }
  0xde   :  { %v83_v13 = vpop.f32.mrb[2].mxu0 }
  0xdf   :  { %v89_v14 = vmul.f32 %v87_v11, %v80_v10  ;;  %v88_v15 = vmul.f32 %v83_v13, %v83_v13  ;;  %v235_v16 = vpop.f32.mrb[3].mxu0 }
  0xe1   :  { %v91_v17 = vmul.f32 0.044715, %v89_v14  ;;  %v90_v18 = vmul.f32 %v88_v15, %v83_v13 }
  0xe3   :  { %v93_v19 = vadd.f32 %v91_v17, %v80_v10  ;;  %v92_v20 = vmul.f32 0.044715, %v90_v18 }
  0xe5   :  { %v95_v21 = vmul.f32 0.7978846, %v93_v19  ;;  %v94_v22 = vadd.f32 %v92_v20, %v83_v13 }
  0xe7   :  { %259 = vtanh.f32 %v95_v21  ;;  %v96_v23 = vmul.f32 0.7978846, %v94_v22 }
  0xe9   :  { %261 = vtanh.f32 %v96_v23 }
  0xf1   :  { %v260_v24 = vpop.eup %259 }
  0xf2   :  { %v99_v25 = vadd.f32 1.0, %v260_v24 }
  0xf3   :  { %v262_v26 = vpop.eup %261 }
  0xf4   :  { %v101_v27 = vmul.f32 0.5, %v99_v25  ;;  %v100_v28 = vadd.f32 1.0, %v262_v26 }
  0xf6   :  { %v102_v29 = vmul.f32 0.5, %v100_v28  ;;  %v103_v30 = vmul.f32 %v101_v27, %v80_v10 }
  0xf8   :  { %v104_v31 = vmul.f32 %v102_v29, %v83_v13 }
  0xfa   :  { %v107_v32 = vpack.c.bf16 %v104_v31, %v103_v30 }
  0xfc   :  { %245 = vmatmul.mubr.msk.bf16.vlgmr.msra.gmra.mrb[0].mxu1 %vm140_vm2, %v107_v32 }
 0x1cf   :  { %v178_v34 = vpop.f32.mrb[0].mxu1 }
 0x1d0   :  { %v185_v36 = vadd.f32 %v178_v34, %v105_v33  ;;  %v246_v37 = vpop.f32.mrb[1].mxu1 }
 0x1d1   :  { %v181_v38 = vpop.f32.mrb[2].mxu1 }
 0x1d2   :  { %187 = vst.msk [vmem:[#allocation2] sm:$0xff] %vm22_vm1, %v185_v36  ;;  %v186_v39 = vadd.f32 %v181_v38, %v106_v35  ;;  %v247_v40 = vpop.f32.mrb[3].mxu1 }
 0x1d4   :  { %188 = vst.msk [vmem:[#allocation2 + $0x8] sm:$0xff] %vm22_vm1, %v186_v39 }
 0x1d9   :  { %v192_v41 = vld [vmem:[#allocation2] sm:$0xff] }
 0x1da   :  { %194 = vst.msk [vmem:[#allocation3] sm:$0xff] %vm22_vm1, %v192_v41 }
 0x1db   :  { %v193_v42 = vld [vmem:[#allocation2 + $0x8] sm:$0xff] }
 0x1dc   :  { %195 = vst.msk [vmem:[#allocation3 + $0x8] sm:$0xff] %vm22_vm1, %v193_v42 }
 0x1dd   :  { %274 = shalt.err (!%p271_p4)
}
 0x1de   :  { %s275_s30 = scalar_lea.hbm %s358_s3, 256 }
 0x1df   :  { %p276_p5 = scmp.ne.s32.totalorder %s358_s3, %s275_s30  ;;  %p279_p6 = scmp.lt.u32.totalorder %s275_s30, %s358_s3 }
 0x1e1   :  { %p281_p7 = pnand %p279_p6, %p276_p5 }
 0x1e3   :  { %284 = shalt.err (!%p281_p7)
}
 0x1e4   :  { %s290_s8 = smov 128   ;;  %s291_s9 = smov 8  }
 0x1e5   :  { %207 = dma.vmem_to_hbm [thread:$0]  %s202_s26, 256, %s358_s3, [#allocation4], %s290_s8, %s290_s8, %s291_s9  }
 0x1e6   :  { %285 = dma.done.wait [#allocation4], 256  }
 0x1e7   :  { %286 = vsyncadd [#allocation4], 4294967040 }
 0x1e8   :  { %211 = vsyncpa [#allocation4], 1 }

</bundles_post_ra>
